<compile_context>
chip_gen: v6e
topology: v6e:2x2x1
jax: 0.10.0
libtpu: 0.0.40
codegen_flags: <defaults>
</compile_context>

<pallas_src>
import math
from functools import partial

import jax
import jax.numpy as jnp
from jax.experimental import pallas as pl
from jax.experimental.pallas import tpu as pltpu

LOG_SIG_MAX = 2.0
LOG_SIG_MIN = -20.0
SIGMA_MULTIPLIER = 1.0


# ----------------------------- kernel ---------------------------------------

def policy_kernel(xt_ref, w_ref, b_ref, out_ref, *, output_dim, num_hidden_layers):
    """Transposed (batch-on-lanes) MLP + fused mu/log_sigma head.

    xt_ref : [S, tb]   bf16   x^T, features padded to S rows
    w_ref  : [L+1, S, S] bf16 packed [out, in] weight slabs (zero padded)
    b_ref  : [L+1, S, 1] f32  packed bias columns (zero padded)
    out_ref: [2*out, tb] f32  rows [0:out) = mu, rows [out:2*out) = sigma
    """
    h = xt_ref[...]                                          # [S, tb] bf16

    # Shared MLP: (Linear + ReLU) x num_hidden_layers, all slabs [S, S].
    # Zero-padded weight rows/cols and zero-padded bias entries keep the
    # padding rows of h identically zero, so the padding is numerically inert.
    for i in range(num_hidden_layers):
        z = jnp.dot(w_ref[i], h, preferred_element_type=jnp.float32) + b_ref[i]
        h = jnp.maximum(z, 0.0).astype(jnp.bfloat16)         # relu in f32, bf16 for MXU

    # Fused head: rows [0:out) = mu pre-activation, [out:2*out) = log_sigma.
    hd = num_hidden_layers
    head = jnp.dot(w_ref[hd], h, preferred_element_type=jnp.float32) + b_ref[hd]

    # Disjoint sublane-aligned row slices -> no lane select, half the
    # transcendental work vs. computing tanh and exp over everything.
    out_ref[:output_dim, :] = jnp.tanh(head[:output_dim, :])
    log_sigma = jnp.clip(head[output_dim:2 * output_dim, :], LOG_SIG_MIN, LOG_SIG_MAX)
    out_ref[output_dim:, :] = jnp.exp(log_sigma) * SIGMA_MULTIPLIER


# ----------------------------- wrapper ---------------------------------------

def player_policy_forward(x, w_all, b_all, *,
                          input_dim, hidden_dim, output_dim,
                          num_hidden_layers=4, max_tile_b=4096,
                          core_parallel=True):
    del hidden_dim  # padded feature size comes from the packed slabs
    batch = x.shape[0]
    two_out = 2 * output_dim
    S = w_all.shape[-1]                       # padded feature dim (>= hidden)

    # Batch lives on the 128-lane axis: pad to a multiple of 128 and pick a
    # large tile (multiple of 128) so per-grid-step overhead is amortized.
    lane = 128
    padded_batch = max(lane, pl.cdiv(batch, lane) * lane)
    tb = max(lane, (min(max_tile_b, padded_batch) // lane) * lane)
    padded_batch = pl.cdiv(padded_batch, tb) * tb
    num_tiles = padded_batch // tb

    # Pad features to S once (so every layer uses the full square slab),
    # transpose to [S, padded_batch], and feed the MXU bf16.
    xp = jnp.zeros((padded_batch, S), jnp.float32).at[:batch, :input_dim].set(x)
    xt = xp.T.astype(jnp.bfloat16)

    kernel = partial(policy_kernel, output_dim=output_dim,
                     num_hidden_layers=num_hidden_layers)

    vmem_full = pl.BlockSpec(memory_space=pltpu.MemorySpace.VMEM)

    # v7x: genuinely split the batch axis across both TensorCores when there
    # is more than one tile; otherwise a plain sequential axis.
    if core_parallel and num_tiles >= 2:
        dim_sem = (pltpu.CORE_PARALLEL,)
    else:
        dim_sem = ("arbitrary",)

    out = pl.pallas_call(
        kernel,
        grid=(num_tiles,),
        in_specs=[
            pl.BlockSpec((S, tb), lambda i: (0, i)),    # x^T, tiled on batch lanes
            vmem_full,                                  # packed bf16 weights
            vmem_full,                                  # packed f32 biases
        ],
        out_specs=pl.BlockSpec((two_out, tb), lambda i: (0, i)),
        out_shape=jax.ShapeDtypeStruct((two_out, padded_batch), jnp.float32),
        compiler_params=pltpu.CompilerParams(dimension_semantics=dim_sem),
    )(xt, w_all, b_all)

    mu = out[:output_dim, :batch].T
    sigma = out[output_dim:two_out, :batch].T
    return mu, sigma


# --------------------------- param packing -----------------------------------

def xavier_uniform(key, fan_in, fan_out):
    # matches nn.init.xavier_uniform_ on a (out, in) weight; stored as (in, out)
    bound = math.sqrt(6.0 / (fan_in + fan_out))
    return jax.random.uniform(key, (fan_in, fan_out), jnp.float32, -bound, bound)


def init_params(key, input_dim, hidden_dim, output_dim, num_hidden_layers=4):
    keys = jax.random.split(key, num_hidden_layers + 2)
    params = {}
    dims = [input_dim] + [hidden_dim] * num_hidden_layers
    for i in range(num_hidden_layers):
        params[f"w{i}"] = xavier_uniform(keys[i], dims[i], dims[i + 1])
        params[f"b{i}"] = jnp.full((1, dims[i + 1]), 0.01, jnp.float32)
    params["wmu"] = xavier_uniform(keys[num_hidden_layers], hidden_dim, output_dim)
    params["bmu"] = jnp.zeros((1, output_dim), jnp.float32)
    params["wls"] = xavier_uniform(keys[num_hidden_layers + 1], hidden_dim, output_dim)
    params["bls"] = jnp.full((1, output_dim), -1.0, jnp.float32)
    return params


def pack_params(params, input_dim, hidden_dim, output_dim, num_hidden_layers=4):
    """Pack all Linear layers into one [L+1, S, S] bf16 weight buffer (PyTorch
    [out, in] layout for the transposed kernel) and one [L+1, S, 1] f32 bias
    buffer. Done once at init."""
    n = num_hidden_layers + 1
    S = max(input_dim, hidden_dim, 2 * output_dim)
    w_all = jnp.zeros((n, S, S), jnp.float32)
    b_all = jnp.zeros((n, S, 1), jnp.float32)

    for i in range(num_hidden_layers):
        w = params[f"w{i}"]                               # (in, out) -> (out, in)
        w_all = w_all.at[i, :w.shape[1], :w.shape[0]].set(w.T)
        b_all = b_all.at[i, :w.shape[1], 0].set(params[f"b{i}"][0])

    # fused head: rows [0:out) = mu, [out:2*out) = log_sigma
    w_all = w_all.at[n - 1, :output_dim, :hidden_dim].set(params["wmu"].T)
    w_all = w_all.at[n - 1, output_dim:2 * output_dim, :hidden_dim].set(params["wls"].T)
    b_all = b_all.at[n - 1, :output_dim, 0].set(params["bmu"][0])
    b_all = b_all.at[n - 1, output_dim:2 * output_dim, 0].set(params["bls"][0])
    return w_all.astype(jnp.bfloat16), b_all


# ------------------------------ reference ------------------------------------

def reference_forward(x, params, num_hidden_layers=4):
    h = x
    for i in range(num_hidden_layers):
        h = jnp.maximum(h @ params[f"w{i}"] + params[f"b{i}"], 0.0)
    mu = jnp.tanh(h @ params["wmu"] + params["bmu"])
    log_sigma = jnp.clip(h @ params["wls"] + params["bls"], LOG_SIG_MIN, LOG_SIG_MAX)
    sigma = jnp.exp(log_sigma) * SIGMA_MULTIPLIER
    return mu, sigma


# -------------------------------- main ---------------------------------------

if __name__ == "__main__":
    input_dim, hidden_dim, output_dim = 16, 32, 8
    num_hidden_layers = 4
    batch = 8

    key = jax.random.PRNGKey(0)
    k_x, k_p = jax.random.split(key)

    x = jax.random.normal(k_x, (batch, input_dim), jnp.float32)
    params = init_params(k_p, input_dim, hidden_dim, output_dim, num_hidden_layers)
    w_all, b_all = pack_params(params, input_dim, hidden_dim, output_dim,
                               num_hidden_layers)

    mu, sigma = player_policy_forward(
        x, w_all, b_all,
        input_dim=input_dim, hidden_dim=hidden_dim, output_dim=output_dim,
        num_hidden_layers=num_hidden_layers)
    jax.block_until_ready((mu, sigma))

    # bf16 MXU feed -> compare against f32 reference with loosened tolerance.
    mu_ref, sigma_ref = reference_forward(x, params, num_hidden_layers)
    assert mu.shape == mu_ref.shape and sigma.shape == sigma_ref.shape
    assert jnp.allclose(mu, mu_ref, rtol=5e-2, atol=5e-2), "mu mismatch"
    assert jnp.allclose(sigma, sigma_ref, rtol=5e-2, atol=5e-2), "sigma mismatch"

    print("KERNEL_OK")
</pallas_src>

<mosaic_0001>
module attributes {stable_mosaic.version = 11 : i64} {
  func.func @policy_kernel(%arg0: i32, %arg1: memref<32x128xbf16, #tpu.memory_space<vmem>>, %arg2: memref<5x32x32xbf16, #tpu.memory_space<vmem>>, %arg3: memref<5x32x1xf32, #tpu.memory_space<vmem>>, %arg4: memref<16x128xf32, #tpu.memory_space<vmem>>) attributes {dimension_semantics = [#tpu.dimension_semantics<arbitrary>], iteration_bounds = array<i64: 1>, scalar_prefetch = 0 : i64, scratch_operands = 0 : i64, tpu.core_type = #tpu.core_type<tc>, window_params = [{transform_indices = @transform_0, window_bounds = array<i64: 32, 128>}, {pipeline_mode = #tpu.pipeline_mode<synchronous>, transform_indices = @transform_1, window_bounds = array<i64: 5, 32, 32>}, {pipeline_mode = #tpu.pipeline_mode<synchronous>, transform_indices = @transform_2, window_bounds = array<i64: 5, 32, 1>}, {transform_indices = @transform_3, window_bounds = array<i64: 16, 128>}]} {
    %c0 = arith.constant 0 : index
    %c0_0 = arith.constant 0 : index
    %0 = vector.load %arg1[%c0, %c0_0] : memref<32x128xbf16, #tpu.memory_space<vmem>>, vector<32x128xbf16>
    %c0_1 = arith.constant 0 : index
    %c0_2 = arith.constant 0 : index
    %c0_3 = arith.constant 0 : index
    %1 = vector.load %arg2[%c0_1, %c0_2, %c0_3] : memref<5x32x32xbf16, #tpu.memory_space<vmem>>, vector<1x32x32xbf16>
    %2 = vector.shape_cast %1 : vector<1x32x32xbf16> to vector<32x32xbf16>
    %cst = arith.constant dense<0.000000e+00> : vector<32x128xf32>
    %3 = tpu.matmul %2, %0, %cst {dimension_numbers = #tpu.dot_dimension_numbers<[1], [0], [0], [1], [0, 0, 1, 1], [], []>} : vector<32x32xbf16>, vector<32x128xbf16>, vector<32x128xf32> -> vector<32x128xf32>
    %c0_4 = arith.constant 0 : index
    %c0_5 = arith.constant 0 : index
    %c0_6 = arith.constant 0 : index
    %4 = vector.load %arg3[%c0_4, %c0_5, %c0_6] : memref<5x32x1xf32, #tpu.memory_space<vmem>>, vector<1x32x1xf32>
    %5 = vector.shape_cast %4 : vector<1x32x1xf32> to vector<32x1xf32>
    %6 = vector.broadcast %5 : vector<32x1xf32> to vector<32x128xf32>
    %7 = arith.addf %3, %6 : vector<32x128xf32>
    %cst_7 = arith.constant 0.000000e+00 : f32
    %8 = vector.broadcast %cst_7 : f32 to vector<32x128xf32>
    %9 = arith.maximumf %7, %8 : vector<32x128xf32>
    %10 = arith.truncf %9 : vector<32x128xf32> to vector<32x128xbf16>
    %c1 = arith.constant 1 : index
    %c0_8 = arith.constant 0 : index
    %c0_9 = arith.constant 0 : index
    %11 = vector.load %arg2[%c1, %c0_8, %c0_9] : memref<5x32x32xbf16, #tpu.memory_space<vmem>>, vector<1x32x32xbf16>
    %12 = vector.shape_cast %11 : vector<1x32x32xbf16> to vector<32x32xbf16>
    %cst_10 = arith.constant dense<0.000000e+00> : vector<32x128xf32>
    %13 = tpu.matmul %12, %10, %cst_10 {dimension_numbers = #tpu.dot_dimension_numbers<[1], [0], [0], [1], [0, 0, 1, 1], [], []>} : vector<32x32xbf16>, vector<32x128xbf16>, vector<32x128xf32> -> vector<32x128xf32>
    %c1_11 = arith.constant 1 : index
    %c0_12 = arith.constant 0 : index
    %c0_13 = arith.constant 0 : index
    %14 = vector.load %arg3[%c1_11, %c0_12, %c0_13] : memref<5x32x1xf32, #tpu.memory_space<vmem>>, vector<1x32x1xf32>
    %15 = vector.shape_cast %14 : vector<1x32x1xf32> to vector<32x1xf32>
    %16 = vector.broadcast %15 : vector<32x1xf32> to vector<32x128xf32>
    %17 = arith.addf %13, %16 : vector<32x128xf32>
    %cst_14 = arith.constant 0.000000e+00 : f32
    %18 = vector.broadcast %cst_14 : f32 to vector<32x128xf32>
    %19 = arith.maximumf %17, %18 : vector<32x128xf32>
    %20 = arith.truncf %19 : vector<32x128xf32> to vector<32x128xbf16>
    %c2 = arith.constant 2 : index
    %c0_15 = arith.constant 0 : index
    %c0_16 = arith.constant 0 : index
    %21 = vector.load %arg2[%c2, %c0_15, %c0_16] : memref<5x32x32xbf16, #tpu.memory_space<vmem>>, vector<1x32x32xbf16>
    %22 = vector.shape_cast %21 : vector<1x32x32xbf16> to vector<32x32xbf16>
    %cst_17 = arith.constant dense<0.000000e+00> : vector<32x128xf32>
    %23 = tpu.matmul %22, %20, %cst_17 {dimension_numbers = #tpu.dot_dimension_numbers<[1], [0], [0], [1], [0, 0, 1, 1], [], []>} : vector<32x32xbf16>, vector<32x128xbf16>, vector<32x128xf32> -> vector<32x128xf32>
    %c2_18 = arith.constant 2 : index
    %c0_19 = arith.constant 0 : index
    %c0_20 = arith.constant 0 : index
    %24 = vector.load %arg3[%c2_18, %c0_19, %c0_20] : memref<5x32x1xf32, #tpu.memory_space<vmem>>, vector<1x32x1xf32>
    %25 = vector.shape_cast %24 : vector<1x32x1xf32> to vector<32x1xf32>
    %26 = vector.broadcast %25 : vector<32x1xf32> to vector<32x128xf32>
    %27 = arith.addf %23, %26 : vector<32x128xf32>
    %cst_21 = arith.constant 0.000000e+00 : f32
    %28 = vector.broadcast %cst_21 : f32 to vector<32x128xf32>
    %29 = arith.maximumf %27, %28 : vector<32x128xf32>
    %30 = arith.truncf %29 : vector<32x128xf32> to vector<32x128xbf16>
    %c3 = arith.constant 3 : index
    %c0_22 = arith.constant 0 : index
    %c0_23 = arith.constant 0 : index
    %31 = vector.load %arg2[%c3, %c0_22, %c0_23] : memref<5x32x32xbf16, #tpu.memory_space<vmem>>, vector<1x32x32xbf16>
    %32 = vector.shape_cast %31 : vector<1x32x32xbf16> to vector<32x32xbf16>
    %cst_24 = arith.constant dense<0.000000e+00> : vector<32x128xf32>
    %33 = tpu.matmul %32, %30, %cst_24 {dimension_numbers = #tpu.dot_dimension_numbers<[1], [0], [0], [1], [0, 0, 1, 1], [], []>} : vector<32x32xbf16>, vector<32x128xbf16>, vector<32x128xf32> -> vector<32x128xf32>
    %c3_25 = arith.constant 3 : index
    %c0_26 = arith.constant 0 : index
    %c0_27 = arith.constant 0 : index
    %34 = vector.load %arg3[%c3_25, %c0_26, %c0_27] : memref<5x32x1xf32, #tpu.memory_space<vmem>>, vector<1x32x1xf32>
    %35 = vector.shape_cast %34 : vector<1x32x1xf32> to vector<32x1xf32>
    %36 = vector.broadcast %35 : vector<32x1xf32> to vector<32x128xf32>
    %37 = arith.addf %33, %36 : vector<32x128xf32>
    %cst_28 = arith.constant 0.000000e+00 : f32
    %38 = vector.broadcast %cst_28 : f32 to vector<32x128xf32>
    %39 = arith.maximumf %37, %38 : vector<32x128xf32>
    %40 = arith.truncf %39 : vector<32x128xf32> to vector<32x128xbf16>
    %c4 = arith.constant 4 : index
    %c0_29 = arith.constant 0 : index
    %c0_30 = arith.constant 0 : index
    %41 = vector.load %arg2[%c4, %c0_29, %c0_30] : memref<5x32x32xbf16, #tpu.memory_space<vmem>>, vector<1x32x32xbf16>
    %42 = vector.shape_cast %41 : vector<1x32x32xbf16> to vector<32x32xbf16>
    %cst_31 = arith.constant dense<0.000000e+00> : vector<32x128xf32>
    %43 = tpu.matmul %42, %40, %cst_31 {dimension_numbers = #tpu.dot_dimension_numbers<[1], [0], [0], [1], [0, 0, 1, 1], [], []>} : vector<32x32xbf16>, vector<32x128xbf16>, vector<32x128xf32> -> vector<32x128xf32>
    %c4_32 = arith.constant 4 : index
    %c0_33 = arith.constant 0 : index
    %c0_34 = arith.constant 0 : index
    %44 = vector.load %arg3[%c4_32, %c0_33, %c0_34] : memref<5x32x1xf32, #tpu.memory_space<vmem>>, vector<1x32x1xf32>
    %45 = vector.shape_cast %44 : vector<1x32x1xf32> to vector<32x1xf32>
    %46 = vector.broadcast %45 : vector<32x1xf32> to vector<32x128xf32>
    %47 = arith.addf %43, %46 : vector<32x128xf32>
    %48 = vector.extract_strided_slice %47 {offsets = [0, 0], sizes = [8, 128], strides = [1, 1]} : vector<32x128xf32> to vector<8x128xf32>
    %49 = math.tanh %48 : vector<8x128xf32>
    %c0_35 = arith.constant 0 : index
    %c0_36 = arith.constant 0 : index
    %50 = vector.load %arg4[%c0_35, %c0_36] : memref<16x128xf32, #tpu.memory_space<vmem>>, vector<8x128xf32>
    tpu.vector_store %arg4[%c0_35, %c0_36], %49 {strides = array<i32>} : memref<16x128xf32, #tpu.memory_space<vmem>>, vector<8x128xf32>,
    %51 = vector.extract_strided_slice %47 {offsets = [8, 0], sizes = [8, 128], strides = [1, 1]} : vector<32x128xf32> to vector<8x128xf32>
    %cst_37 = arith.constant -2.000000e+01 : f32
    %cst_38 = arith.constant 2.000000e+00 : f32
    %52 = vector.broadcast %cst_37 : f32 to vector<8x128xf32>
    %53 = arith.maximumf %52, %51 : vector<8x128xf32>
    %54 = vector.broadcast %cst_38 : f32 to vector<8x128xf32>
    %55 = arith.minimumf %54, %53 : vector<8x128xf32>
    %56 = math.exp %55 : vector<8x128xf32>
    %cst_39 = arith.constant 1.000000e+00 : f32
    %57 = vector.broadcast %cst_39 : f32 to vector<8x128xf32>
    %58 = arith.mulf %56, %57 : vector<8x128xf32>
    %c8 = arith.constant 8 : index
    %c0_40 = arith.constant 0 : index
    %59 = vector.load %arg4[%c8, %c0_40] : memref<16x128xf32, #tpu.memory_space<vmem>>, vector<8x128xf32>
    tpu.vector_store %arg4[%c8, %c0_40], %58 {strides = array<i32>} : memref<16x128xf32, #tpu.memory_space<vmem>>, vector<8x128xf32>,
    return
  }
  func.func @transform_0(%arg0: i32) -> (i32, i32) {
    %c0_i32 = arith.constant 0 : i32
    %c0_i32_0 = arith.constant 0 : i32
    return %c0_i32, %arg0 : i32, i32
  }
  func.func @transform_1(%arg0: i32) -> (i32, i32, i32) {
    %c0_i32 = arith.constant 0 : i32
    %c0_i32_0 = arith.constant 0 : i32
    %c0_i32_1 = arith.constant 0 : i32
    %c0_i32_2 = arith.constant 0 : i32
    return %c0_i32, %c0_i32_0, %c0_i32_1 : i32, i32, i32
  }
  func.func @transform_2(%arg0: i32) -> (i32, i32, i32) {
    %c0_i32 = arith.constant 0 : i32
    %c0_i32_0 = arith.constant 0 : i32
    %c0_i32_1 = arith.constant 0 : i32
    %c0_i32_2 = arith.constant 0 : i32
    return %c0_i32, %c0_i32_0, %c0_i32_1 : i32, i32, i32
  }
  func.func @transform_3(%arg0: i32) -> (i32, i32) {
    %c0_i32 = arith.constant 0 : i32
    %c0_i32_0 = arith.constant 0 : i32
    return %c0_i32, %arg0 : i32, i32
  }
}

</mosaic_0001>

<bundles_post_ra>
// kernel: tpu_custom_call.1
= control target key start
LH: loop header
LB: loop body
LE: loop exit
PB: predicated region body
PF: predicated region fallthrough
CT: control target
= control target key end

     0   :  { %vm70_vm0 = vcmask 261120   ;;  %v707_v3 = vmov 0   ;;  %s834_s0 = inlined_call_operand.vmem [shape: bf16[32,128], index: 0, kind: input, shape index: {}]   ;;  %s835_s1 = inlined_call_operand.vmem [shape: bf16[5,32,32], index: 1, kind: input, shape index: {}]   ;;  %s836_s2 = inlined_call_operand.vmem [shape: f32[5,32,1], index: 2, kind: input, shape index: {}]   ;;  %s837_s3 = inlined_call_operand.hbm [shape: f32[16,128], index: 3, kind: output, shape index: {}]  }
   0x1   :  { %v669_v0 = vld [vmem:[%s834_s0 + $0x8] sm:$0xff]   ;;  %v670_v1 = vld [vmem:[%s834_s0] sm:$0xff]   ;;  %667 = vset.pattern.permute.xlu0 %v707_v3  ;;  %668 = vset.pattern.permute.xlu1 %v707_v3  ;;  %v26_v4 = vld [vmem:[%s836_s2 + $0x10] sm:$0xff] }
   0x2   :  { %623 = vmatprep.subr.bf16.mxu0 %v669_v0  ;;  %v671_v2 = vld [vmem:[%s835_s1] sm:$0xff]   ;;  %40 = vperm.xlu0 %667, %v26_v4   ;;  %v672_v6 = vld [vmem:[%s835_s1 + $0x8] sm:$0xff]   ;;  %v27_v7 = vld [vmem:[%s836_s2 + $0x18] sm:$0xff] }
   0x3   :  { %624 = vmatpush3.bf16.msra.mxu0 %v669_v0  ;;  %627 = vmatprep.mubr.msk.bf16.mxu0 %vm70_vm0, %v671_v2  ;;  %v24_v5 = vld [vmem:[%s836_s2] sm:$0xff]  ;;  %v25_v8 = vld [vmem:[%s836_s2 + $0x8] sm:$0xff]  ;;  %v561_v9 = vld [vmem:[%s836_s2 + $0x30] sm:$0xff] }
   0x4   :  { %625 = vmatprep.subr.bf16.mxu0 %v670_v1  ;;  %30 = vperm.xlu1 %668, %v24_v5   ;;  %v562_v10 = vld [vmem:[%s836_s2 + $0x38] sm:$0xff]  ;;  %v559_v11 = vld [vmem:[%s836_s2 + $0x20] sm:$0xff]  ;;  %v560_v12 = vld [vmem:[%s836_s2 + $0x28] sm:$0xff] }
   0x6   :  { %45 = vperm.xlu0 %667, %v27_v7  }
   0x7   :  { %626 = vmatpush3.bf16.msra.mxu0 %v670_v1 }
   0x8   :  { %35 = vperm.xlu1 %668, %v25_v8  }
   0xa   :  { %628 = vmatmul.mubr.msk.bf16.vlgmr.msra.gmra.mxu0 %vm70_vm0, %v672_v6  ;;  %154 = vperm.xlu0 %667, %v561_v9  }
   0xc   :  { %159 = vperm.xlu1 %668, %v562_v10  }
   0xd   :  { %8 = vsyncpa [#allocation3], 0  ;;  %v573_v13 = vld [vmem:[%s836_s2 + $0x50] sm:$0xff]  ;;  %v574_v14 = vld [vmem:[%s836_s2 + $0x58] sm:$0xff]  ;;  %s708_s15 = smov [#allocation2]  }
   0xe   :  { %144 = vperm.xlu0 %667, %v559_v11   ;;  %v571_v15 = vld [vmem:[%s836_s2 + $0x40] sm:$0xff]  ;;  %v572_v16 = vld [vmem:[%s836_s2 + $0x48] sm:$0xff]  ;;  %v585_v17 = vld [vmem:[%s836_s2 + $0x70] sm:$0xff] }
   0xf   :  { %v586_v18 = vld [vmem:[%s836_s2 + $0x78] sm:$0xff]  ;;  %v583_v19 = vld [vmem:[%s836_s2 + $0x60] sm:$0xff]  ;;  %v584_v20 = vld [vmem:[%s836_s2 + $0x68] sm:$0xff] }
  0x10   :  { %149 = vperm.xlu1 %668, %v560_v12   ;;  %v596_v21 = vld [vmem:[%s836_s2 + $0x88] sm:$0xff]  ;;  %v595_v22 = vld [vmem:[%s836_s2 + $0x80] sm:$0xff]  ;;  %v673_v23 = vld [vmem:[%s835_s1 + $0x10] sm:$0xff]  }
  0x11   :  { %635 = vmatprep.mubr.msk.bf16.mxu1 %vm70_vm0, %v673_v23  ;;  %v674_v42 = vld [vmem:[%s835_s1 + $0x18] sm:$0xff]   ;;  %v675_v43 = vld [vmem:[%s835_s1 + $0x20] sm:$0xff]   ;;  %v676_v62 = vld [vmem:[%s835_s1 + $0x28] sm:$0xff]  }
  0x12   :  { %255 = vperm.xlu0 %667, %v573_v13   ;;  %643 = vmatprep.mubr.msk.bf16.mxu0 %vm70_vm0, %v675_v43  ;;  %v677_v63 = vld [vmem:[%s835_s1 + $0x30] sm:$0xff]  }
  0x14   :  { %260 = vperm.xlu1 %668, %v574_v14  }
  0x16   :  { %245 = vperm.xlu0 %667, %v571_v15  }
  0x18   :  { %250 = vperm.xlu1 %668, %v572_v16  }
  0x1a   :  { %356 = vperm.xlu0 %667, %v585_v17  }
  0x1c   :  { %361 = vperm.xlu1 %668, %v586_v18   ;;  %v678_v18 = vld [vmem:[%s835_s1 + $0x38] sm:$0xff]  }
  0x1e   :  { %346 = vperm.xlu0 %667, %v583_v19   ;;  %v679_v19 = vld [vmem:[%s835_s1 + $0x40] sm:$0xff]  }
  0x20   :  { %351 = vperm.xlu1 %668, %v584_v20  }
  0x22   :  { %452 = vperm.xlu0 %667, %v596_v21  }
  0x24   :  { %447 = vperm.xlu1 %668, %v595_v22  }
  0x7d   :  { %v41_v24 = vpop.permute.xlu0 %40 }
  0x7f   :  { %v31_v25 = vpop.permute.xlu1 %30 }
  0x81   :  { %v46_v29 = vpop.permute.xlu0 %45 }
  0x83   :  { %v36_v33 = vpop.permute.xlu1 %35 }
  0x85   :  { %v155_v44 = vpop.permute.xlu0 %154 }
  0x87   :  { %v160_v45 = vpop.permute.xlu1 %159 }
  0x89   :  { %v145_v49 = vpop.permute.xlu0 %144 }
  0x8b   :  { %v150_v53 = vpop.permute.xlu1 %149 }
  0x8d   :  { %v256_v0 = vpop.permute.xlu0 %255 }
  0x8f   :  { %v261_v1 = vpop.permute.xlu1 %260 }
  0x91   :  { %v246_v5 = vpop.permute.xlu0 %245 }
  0x93   :  { %v251_v9 = vpop.permute.xlu1 %250 }
  0x95   :  { %v357_v20 = vpop.permute.xlu0 %356 }
  0x97   :  { %v362_v21 = vpop.permute.xlu1 %361 }
  0xca   :  { %v629_v26 = vpop.f32.mrf.mxu0 }
  0xcb   :  { %v120_v28 = vadd.f32 %v629_v26, %v41_v24 }
  0xcc   :  { %v111_v27 = vpop.f32.mrf.mxu0 }
  0xcd   :  { %v112_v31 = vadd.f32 %v111_v27, %v31_v25  ;;  %v128_v35 = vmax.f32 %v120_v28, 0.0  ;;  %v347_v25 = vpop.permute.xlu0 %346 }
  0xce   :  { %v630_v30 = vpop.f32.mrf.mxu0 }
  0xcf   :  { %v123_v32 = vadd.f32 %v630_v30, %v46_v29  ;;  %v126_v38 = vmax.f32 %v112_v31, 0.0  ;;  %v352_v29 = vpop.permute.xlu1 %351 }
  0xd0   :  { %v114_v34 = vpop.f32.mrf.mxu0 }
  0xd1   :  { %v129_v36 = vmax.f32 %v123_v32, 0.0  ;;  %v115_v37 = vadd.f32 %v114_v34, %v36_v33 }
  0xd3   :  { %v127_v39 = vmax.f32 %v115_v37, 0.0  ;;  %v131_v40 = vpack.c.bf16 %v129_v36, %v128_v35 }
  0xd5   :  { %v130_v41 = vpack.c.bf16 %v127_v39, %v126_v38  ;;  %631 = vmatprep.subr.bf16.mxu1 %v131_v40  ;;  %v680_v38 = vld [vmem:[%s835_s1 + $0x48] sm:$0xff]   ;;  %s538_s1 = sshll.u32 %s708_s15, 4  ;;  %s539_s1 = int_to_ptr.vmem [resolvable:$true] %s538_s1 }
  0xd6   :  { %632 = vmatpush3.bf16.msra.mxu1 %v131_v40  ;;  %v448_v40 = vpop.permute.xlu1 %447  ;;  %s685_s16 = scalar_lea.vmem %s539_s1, 256  ;;  %p690_p1 = scmp.lt.s32.totalorder %s539_s1, %s539_s1 }
  0xd7   :  { %633 = vmatprep.subr.bf16.mxu1 %v130_v41  ;;  %p686_p0 = scmp.ne.s32.totalorder %s539_s1, %s685_s16  ;;  %p691_p2 = scmp.lt.s32.totalorder %s685_s16, %s685_s16 }
  0xd9   :  { %p692_p3 = por %p691_p2, %p690_p1 }
  0xda   :  { %634 = vmatpush3.bf16.msra.mxu1 %v130_v41 }
  0xdb   :  { %p693_p4 = pnand %p692_p3, %p686_p0 }
  0xdd   :  { %636 = vmatmul.mubr.msk.bf16.vlgmr.msra.gmra.mxu1 %vm70_vm0, %v674_v42 }
  0xde   :  { %651 = vmatprep.mubr.msk.bf16.mxu1 %vm70_vm0, %v677_v63 }
 0x19d   :  { %v637_v46 = vpop.f32.mrf.mxu1 }
 0x19e   :  { %v221_v48 = vadd.f32 %v637_v46, %v155_v44  ;;  %v453_v44 = vpop.permute.xlu0 %452 }
 0x19f   :  { %v212_v47 = vpop.f32.mrf.mxu1 }
 0x1a0   :  { %v213_v51 = vadd.f32 %v212_v47, %v145_v49  ;;  %v229_v55 = vmax.f32 %v221_v48, 0.0 }
 0x1a1   :  { %v638_v50 = vpop.f32.mrf.mxu1 }
 0x1a2   :  { %v224_v52 = vadd.f32 %v638_v50, %v160_v45  ;;  %v227_v58 = vmax.f32 %v213_v51, 0.0 }
 0x1a3   :  { %v215_v54 = vpop.f32.mrf.mxu1 }
 0x1a4   :  { %v230_v56 = vmax.f32 %v224_v52, 0.0  ;;  %v216_v57 = vadd.f32 %v215_v54, %v150_v53 }
 0x1a6   :  { %v232_v59 = vpack.c.bf16 %v230_v56, %v229_v55  ;;  %v228_v60 = vmax.f32 %v216_v57, 0.0 }
 0x1a8   :  { %v231_v61 = vpack.c.bf16 %v228_v60, %v227_v58  ;;  %639 = vmatprep.subr.bf16.mxu0 %v232_v59 }
 0x1a9   :  { %640 = vmatpush3.bf16.msra.mxu0 %v232_v59 }
 0x1aa   :  { %641 = vmatprep.subr.bf16.mxu0 %v231_v61 }
 0x1ad   :  { %642 = vmatpush3.bf16.msra.mxu0 %v231_v61 }
 0x1b0   :  { %644 = vmatmul.mubr.msk.bf16.vlgmr.msra.gmra.mxu0 %vm70_vm0, %v676_v62 }
 0x1b1   :  { %659 = vmatprep.mubr.msk.bf16.mxu0 %vm70_vm0, %v679_v19 }
 0x270   :  { %v645_v2 = vpop.f32.mrf.mxu0 }
 0x271   :  { %v322_v4 = vadd.f32 %v645_v2, %v256_v0 }
 0x272   :  { %v313_v3 = vpop.f32.mrf.mxu0 }
 0x273   :  { %v314_v7 = vadd.f32 %v313_v3, %v246_v5  ;;  %v330_v11 = vmax.f32 %v322_v4, 0.0 }
 0x274   :  { %v646_v6 = vpop.f32.mrf.mxu0 }
 0x275   :  { %v325_v8 = vadd.f32 %v646_v6, %v261_v1  ;;  %v328_v14 = vmax.f32 %v314_v7, 0.0 }
 0x276   :  { %v316_v10 = vpop.f32.mrf.mxu0 }
 0x277   :  { %v331_v12 = vmax.f32 %v325_v8, 0.0  ;;  %v317_v13 = vadd.f32 %v316_v10, %v251_v9 }
 0x279   :  { %v333_v15 = vpack.c.bf16 %v331_v12, %v330_v11  ;;  %v329_v16 = vmax.f32 %v317_v13, 0.0 }
 0x27b   :  { %v332_v17 = vpack.c.bf16 %v329_v16, %v328_v14  ;;  %647 = vmatprep.subr.bf16.mxu1 %v333_v15 }
 0x27c   :  { %648 = vmatpush3.bf16.msra.mxu1 %v333_v15 }
 0x27d   :  { %649 = vmatprep.subr.bf16.mxu1 %v332_v17 }
 0x280   :  { %650 = vmatpush3.bf16.msra.mxu1 %v332_v17 }
 0x283   :  { %652 = vmatmul.mubr.msk.bf16.vlgmr.msra.gmra.mxu1 %vm70_vm0, %v678_v18 }
 0x343   :  { %v653_v22 = vpop.f32.mrf.mxu1 }
 0x344   :  { %v423_v24 = vadd.f32 %v653_v22, %v357_v20 }
 0x345   :  { %v414_v23 = vpop.f32.mrf.mxu1 }
 0x346   :  { %v415_v27 = vadd.f32 %v414_v23, %v347_v25  ;;  %v431_v31 = vmax.f32 %v423_v24, 0.0 }
 0x347   :  { %v654_v26 = vpop.f32.mrf.mxu1 }
 0x348   :  { %v426_v28 = vadd.f32 %v654_v26, %v362_v21  ;;  %v429_v34 = vmax.f32 %v415_v27, 0.0 }
 0x349   :  { %v417_v30 = vpop.f32.mrf.mxu1 }
 0x34a   :  { %v432_v32 = vmax.f32 %v426_v28, 0.0  ;;  %v418_v33 = vadd.f32 %v417_v30, %v352_v29 }
 0x34c   :  { %v434_v35 = vpack.c.bf16 %v432_v32, %v431_v31  ;;  %v430_v36 = vmax.f32 %v418_v33, 0.0 }
 0x34e   :  { %v433_v37 = vpack.c.bf16 %v430_v36, %v429_v34  ;;  %655 = vmatprep.subr.bf16.mxu0 %v434_v35 }
 0x34f   :  { %656 = vmatpush3.bf16.msra.mxu0 %v434_v35 }
 0x350   :  { %657 = vmatprep.subr.bf16.mxu0 %v433_v37 }
 0x353   :  { %658 = vmatpush3.bf16.msra.mxu0 %v433_v37 }
 0x356   :  { %660 = vmatmul.mubr.msk.bf16.vlgmr.msra.gmra.mxu0 %vm70_vm0, %v680_v38 }
 0x416   :  { %v661_v39 = vpop.f32.mrf.mxu0 }
 0x418   :  { %v513_v41 = vpop.f32.mrf.mxu0 }
 0x419   :  { %v514_v42 = vadd.f32 %v513_v41, %v448_v40 }
 0x41a   :  { %v662_v43 = vpop.f32.mrf.mxu0 }
 0x41b   :  { %681 = vtanh.f32 %v514_v42 }
 0x41c   :  { %v516_v45 = vpop.f32.mrf.mxu0 }
 0x41d   :  { %v517_v46 = vadd.f32 %v516_v45, %v453_v44 }
 0x41f   :  { %v528_v47 = vmax.f32 %v517_v46, -20.0 }
 0x421   :  { %v529_v48 = vmin.f32 %v528_v47, 2.0 }
 0x423   :  { %v530_v49 = vmul.f32 1.442695, %v529_v48 }
 0x425   :  { %683 = vpow2.f32 %v530_v49 }
 0x428   :  { %v682_v50 = vpop.eup %681 }
 0x429   :  { %527 = vst [vmem:[#allocation2] sm:$0xff] %v682_v50 }
 0x432   :  { %v684_v51 = vpop.eup %683 }
 0x433   :  { %532 = vst [vmem:[#allocation2 + $0x8] sm:$0xff] %v684_v51 }
 0x434   :  { %696 = shalt.err (!%p693_p4)
}
 0x435   :  { %s709_s17 = smov 128   ;;  %s710_s18 = smov 8  }
 0x436   :  { %544 = dma.vmem_to_hbm [thread:$0]  %s539_s1, 256, %s837_s3, [#allocation3], %s709_s17, %s709_s17, %s710_s18  }
 0x437   :  { %705 = dma.done.wait [#allocation3], 256  }
 0x438   :  { %706 = vsyncadd [#allocation3], 4294967040 }
 0x439   :  { %548 = vsyncpa [#allocation3], 1 }

</bundles_post_ra>
